<compile_context>
chip_gen: v7x
topology: tpu7x:2x2x1
jax: 0.10.0
libtpu: 0.0.40
codegen_flags: <defaults>
</compile_context>

<pallas_src>
import functools

import jax
import jax.numpy as jnp
from jax.experimental import pallas as pl
from jax.experimental.pallas import tpu as pltpu

IN_FEATURES = 900
NUM_CLASSES = 10000


def _fc2_kernel(h_ref, w2_ref, b2_ref, out_ref):
    # out_tile = h @ w2_tile + b2_tile
    # bf16 x bf16 native MXU matmul, f32 accumulation, f32 store.
    out_ref[...] = (
        jnp.dot(h_ref[...], w2_ref[...], preferred_element_type=jnp.float32)
        + b2_ref[...]
    ).astype(out_ref.dtype)


def _vmem_capacity_bytes():
    try:
        return int(pltpu.get_tpu_info().vmem_capacity_bytes)
    except Exception:
        return 64 * 1024 * 1024  # conservative fallback (v7x per-core VMEM)


def pick_tile_n(middle, batch=8, n_out=NUM_CLASSES):
    """Lane-aligned fc2 output-tile width.

    The budget covers the true per-step footprint: 2x (double-buffered) bf16
    w2 tiles + 2x f32 b2 tiles + 2x f32 output tiles + the resident bf16 h,
    and is generation-aware (v7x only has 64 MiB physical VMEM).  The grid is
    kept at >= 2 steps so the "parallel" axis can split the w2 stream across
    v7x's two TensorCores; otherwise the tile is as large as possible so
    v5e/v6e don't pay per-step overhead for tiny `middle`.
    """
    cap = _vmem_capacity_bytes()
    budget = min(int(cap * 0.6), 48 * 1024 * 1024)
    fixed = 2 * batch * middle * 2 + (2 << 20)          # resident bf16 h + slack
    per_lane = 2 * (middle * 2 + 4 + batch * 4)         # w2 + b2 + out, x2 buffers
    t_max = max(128, ((budget - fixed) // per_lane // 128) * 128)
    steps = max(2, -(-n_out // t_max))                  # at least 2 (v7x megacore)
    q = -(-n_out // steps)                              # ceil(n_out / steps)
    tile_n = -(-q // 128) * 128                         # 128-lane aligned
    return max(128, min(tile_n, t_max))


def prepare_params(w1, b1, w2, b2, tile_n):
    """One-time weight prep (OUT of the forward path): bf16 cast + lane padding."""
    n_out = w2.shape[1]
    n_pad = -(-n_out // tile_n) * tile_n
    w1f = w1.astype(jnp.float32)                         # (900, middle), tiny -> keep f32
    b1f = b1.astype(jnp.float32)                         # (middle,)
    w2p = jnp.pad(w2, ((0, 0), (0, n_pad - n_out))).astype(jnp.bfloat16)
    b2p = jnp.pad(b2, (0, n_pad - n_out)).astype(jnp.float32).reshape(1, n_pad)
    return w1f, b1f, w2p, b2p


@functools.partial(jax.jit, static_argnames=("n_out", "tile_n"))
def net_forward(x, w1, b1, w2p, b2p, *, n_out, tile_n):
    """Forward pass. Returns (output, hidden) exactly like Net.forward.

    x:   any shape (B, ...) with prod(...) == 900  (e.g. NCHW (B, 1, 30, 30))
    w1:  (900, middle) f32        b1:  (middle,) f32
    w2p: (middle, n_pad) bf16     b2p: (1, n_pad) f32    (from prepare_params)
    """
    B = x.shape[0]
    x2d = x.reshape(B, -1).astype(jnp.float32)           # == x.view(B, -1)
    assert x2d.shape[1] == IN_FEATURES

    middle = w1.shape[1]
    n_pad = w2p.shape[1]
    assert n_pad % tile_n == 0

    # ---- fc1: tiny (B,900)x(900,middle); done by XLA inside the same jit ----
    h = jnp.dot(x2d, w1, precision=jax.lax.Precision.HIGHEST) + b1   # (B, middle) f32
    h_bf = h.astype(jnp.bfloat16)                                    # bf16 feed for fc2 MXU

    # ---- explicit, generation-aware scoped-VMEM sizing for fc2 --------------
    need = (2 * middle * tile_n * 2      # double-buffered bf16 w2 tiles
            + 2 * tile_n * 4             # double-buffered f32 b2 tiles
            + 2 * B * tile_n * 4         # double-buffered f32 output tiles
            + 2 * B * middle * 2)        # resident bf16 h (both buffers)
    vmem_limit = int(min(max(need + (4 << 20), 32 << 20),
                         int(_vmem_capacity_bytes() * 0.9)))

    # ---- fc2: mem-bound w2 stream, tiled + parallel over the output dim -----
    grid = (n_pad // tile_n,)
    out_p = pl.pallas_call(
        _fc2_kernel,
        out_shape=jax.ShapeDtypeStruct((B, n_pad), jnp.float32),
        grid_spec=pltpu.PrefetchScalarGridSpec(
            num_scalar_prefetch=0,
            grid=grid,
            in_specs=[
                pl.BlockSpec((B, middle), lambda j: (0, 0)),        # h (bf16, resident)
                pl.BlockSpec((middle, tile_n), lambda j: (0, j)),   # w2 tile (bf16 stream)
                pl.BlockSpec((1, tile_n), lambda j: (0, j)),        # b2 tile (f32)
            ],
            out_specs=pl.BlockSpec((B, tile_n), lambda j: (0, j)),  # output tile (f32)
        ),
        compiler_params=pltpu.CompilerParams(
            # Independent output tiles -> megacore sharding on v7x (>=2 steps).
            dimension_semantics=("parallel",),
            vmem_limit_bytes=vmem_limit,
        ),
        cost_estimate=pl.CostEstimate(
            flops=2 * B * middle * n_pad,
            transcendentals=0,
            bytes_accessed=(middle * n_pad * 2 + n_pad * 4
                            + B * middle * 2 + B * n_pad * 4),
        ),
    )(h_bf, w2p, b2p)

    # TODO(synk): for large B, emit an unpadded (B, 10000) output (mask the last
    # tile) instead of this slice copy; negligible at small B.
    return out_p[:, :n_out], h


def init_params(key, middle):
    """Deterministic init matching nn.Linear shapes (uniform +-1/sqrt(fan_in))."""
    k1, k2, k3, k4 = jax.random.split(key, 4)
    lim1 = 1.0 / jnp.sqrt(jnp.float32(IN_FEATURES))
    lim2 = 1.0 / jnp.sqrt(jnp.float32(middle))
    w1 = jax.random.uniform(k1, (IN_FEATURES, middle), jnp.float32, -lim1, lim1)
    b1 = jax.random.uniform(k2, (middle,), jnp.float32, -lim1, lim1)
    w2 = jax.random.uniform(k3, (middle, NUM_CLASSES), jnp.float32, -lim2, lim2)
    b2 = jax.random.uniform(k4, (NUM_CLASSES,), jnp.float32, -lim2, lim2)
    return w1, b1, w2, b2


if __name__ == "__main__":
    key = jax.random.PRNGKey(0)
    k_x, k_p = jax.random.split(key)

    middle = 32                        # the `weight` constructor arg
    batch = 2
    # NCHW input whose flattened feature size is 900 (1 * 30 * 30)
    x = jax.random.normal(k_x, (batch, 1, 30, 30), jnp.float32)

    w1, b1, w2, b2 = init_params(k_p, middle)

    tile_n = pick_tile_n(middle, batch)                     # 5120 -> 2 parallel steps
    w1f, b1f, w2p, b2p = prepare_params(w1, b1, w2, b2, tile_n)   # done once

    out, hidden = net_forward(x, w1f, b1f, w2p, b2p,
                              n_out=NUM_CLASSES, tile_n=tile_n)
    jax.block_until_ready((out, hidden))

    # Reference check in plain JAX.
    x2d = x.reshape(batch, -1)
    h_ref = jnp.dot(x2d, w1, precision=jax.lax.Precision.HIGHEST) + b1
    # Kernel-exactness reference: same bf16 quantization of h and w2, f32 accum.
    h_q = h_ref.astype(jnp.bfloat16).astype(jnp.float32)
    w2_q = w2p.astype(jnp.float32)[:, :NUM_CLASSES]
    out_ref = jnp.dot(h_q, w2_q, precision=jax.lax.Precision.HIGHEST) + b2

    assert out.shape == (batch, NUM_CLASSES) and hidden.shape == (batch, middle)
    assert jnp.allclose(hidden, h_ref, atol=1e-4, rtol=1e-4)
    assert jnp.allclose(out, out_ref, atol=1e-2, rtol=1e-2)

    print("KERNEL_OK")
</pallas_src>

<mosaic_0001>
module attributes {stable_mosaic.version = 11 : i64} {
  func.func @_fc2_kernel(%arg0: i32, %arg1: memref<2x32xbf16, #tpu.memory_space<vmem>>, %arg2: memref<32x5120xbf16, #tpu.memory_space<vmem>>, %arg3: memref<1x5120xf32, #tpu.memory_space<vmem>>, %arg4: memref<2x5120xf32, #tpu.memory_space<vmem>>) attributes {dimension_semantics = [#tpu.dimension_semantics<parallel>], iteration_bounds = array<i64: 2>, scalar_prefetch = 0 : i64, scratch_operands = 0 : i64, tpu.core_type = #tpu.core_type<tc>, window_params = [{pipeline_mode = #tpu.pipeline_mode<synchronous>, transform_indices = @transform_0, window_bounds = array<i64: 2, 32>}, {transform_indices = @transform_1, window_bounds = array<i64: 32, 5120>}, {transform_indices = @transform_2, window_bounds = array<i64: 1, 5120>}, {transform_indices = @transform_3, window_bounds = array<i64: 2, 5120>}]} {
    %c0 = arith.constant 0 : index
    %c0_0 = arith.constant 0 : index
    %0 = vector.load %arg1[%c0, %c0_0] : memref<2x32xbf16, #tpu.memory_space<vmem>>, vector<2x32xbf16>
    %c0_1 = arith.constant 0 : index
    %c0_2 = arith.constant 0 : index
    %1 = vector.load %arg2[%c0_1, %c0_2] : memref<32x5120xbf16, #tpu.memory_space<vmem>>, vector<32x5120xbf16>
    %cst = arith.constant dense<0.000000e+00> : vector<2x5120xf32>
    %2 = tpu.matmul %0, %1, %cst {dimension_numbers = #tpu.dot_dimension_numbers<[1], [0], [0], [1], [0, 0, 1, 1], [], []>} : vector<2x32xbf16>, vector<32x5120xbf16>, vector<2x5120xf32> -> vector<2x5120xf32>
    %c0_3 = arith.constant 0 : index
    %c0_4 = arith.constant 0 : index
    %3 = vector.load %arg3[%c0_3, %c0_4] : memref<1x5120xf32, #tpu.memory_space<vmem>>, vector<1x5120xf32>
    %4 = vector.broadcast %3 : vector<1x5120xf32> to vector<2x5120xf32>
    %5 = arith.addf %2, %4 : vector<2x5120xf32>
    %c0_5 = arith.constant 0 : index
    %c0_6 = arith.constant 0 : index
    %6 = vector.load %arg4[%c0_5, %c0_6] : memref<2x5120xf32, #tpu.memory_space<vmem>>, vector<2x5120xf32>
    tpu.vector_store %arg4[%c0_5, %c0_6], %5 {strides = array<i32>} : memref<2x5120xf32, #tpu.memory_space<vmem>>, vector<2x5120xf32>,
    return
  }
  func.func @transform_0(%arg0: i32) -> (i32, i32) {
    %c0_i32 = arith.constant 0 : i32
    %c0_i32_0 = arith.constant 0 : i32
    %c0_i32_1 = arith.constant 0 : i32
    return %c0_i32, %c0_i32_0 : i32, i32
  }
  func.func @transform_1(%arg0: i32) -> (i32, i32) {
    %c0_i32 = arith.constant 0 : i32
    %c0_i32_0 = arith.constant 0 : i32
    return %c0_i32, %arg0 : i32, i32
  }
  func.func @transform_2(%arg0: i32) -> (i32, i32) {
    %c0_i32 = arith.constant 0 : i32
    %c0_i32_0 = arith.constant 0 : i32
    return %c0_i32, %arg0 : i32, i32
  }
  func.func @transform_3(%arg0: i32) -> (i32, i32) {
    %c0_i32 = arith.constant 0 : i32
    %c0_i32_0 = arith.constant 0 : i32
    return %c0_i32, %arg0 : i32, i32
  }
}

</mosaic_0001>

<bundles_post_ra>
// kernel: net_forward.1
= control target key start
LH: loop header
LB: loop body
LE: loop exit
PB: predicated region body
PF: predicated region fallthrough
CT: control target
= control target key end

     0   :  { %8 = vsyncpa [#allocation3], 0  ;;  %s2672_s0 = inlined_call_operand.vmem [shape: bf16[2,32], index: 0, kind: input, shape index: {}]   ;;  %s2673_s1 = inlined_call_operand.hbm [shape: bf16[32,10240], index: 1, kind: input, shape index: {}]   ;;  %s2674_s2 = inlined_call_operand.vmem [shape: f32[1,10240], index: 2, kind: input, shape index: {}]   ;;  %s2675_s3 = inlined_call_operand.vmem [shape: f32[2,10240], index: 3, kind: output, shape index: {}]  }
   0x1   :  { %10 = vsyncpa [#allocation3 + $0x1], 0  ;;  %s2282_s12 = smov 0   ;;  %s2284_s13 = smov 0  }
   0x2   :  { %s2286_s14 = smov 0   ;;  %s2288_s15 = smov 0  }
   0x3 LB: > { %s2034_s16 = sadd.s32 4294967295, %s2254_s15   ;;  %s2302_s17 = sadd.s32 1, %s2254_s15   ;;  %s2254_s15 = sphi %s2288_s15, %s2681_s15   ;;  %s2250_s14 = sphi %s2286_s14, %s2680_s14   ;;  %s2246_s13 = sphi %s2284_s13, %s2679_s13   ;;  %s2242_s12 = sphi %s2282_s12, %s2678_s12  }
   0x4   : > { %s41_s18 = ssub.s32 %s2254_s15, %s2302_s17  ;;  %s44_s19 = sadd.s32 1, %s2250_s14 }
   0x5   : > { %p42_p0 = scmp.eq.s32.totalorder %s41_s18, 0  ;;  %p51_p1 = scmp.ne.s32.totalorder %s2250_s14, %s2246_s13 }
   0x6   : > { %p52_p2 = scmp.eq.s32.totalorder %s2254_s15, 0  ;;  %p57_p3 = scmp.ne.s32.totalorder %s2246_s13, %s2242_s12 }
   0x7   : > { %s2312_s20 = scalar_select %p42_p0, %s2250_s14, %s44_s19  }
   0x8   : > { %p53_p4 = por %p52_p2, %p51_p1  ;;  %p58_p5 = scmp.eq.s32.totalorder %s2034_s16, 0 }
   0x9   : > { %p2152_p6 = scmp.lt.s32.totalorder %s2254_s15, 2  ;;  %s136_s22 = sand.u32 1, %s2250_s14  }
   0xa   : > { %p2317_p7 = por %p58_p5, %p57_p3  ;;  %s2144_s23 = smul.u32 640, %s136_s22 }
   0xb   : > { %s2143_s24 = smul.u32 2560, %s2254_s15  ;;  %p2323_p8 = pnand %p2152_p6, %p53_p4 }
   0xc   : > { %s140_s29 = scalar_lea.vmem [#allocation2], %s2144_s23  ;;  %s2334_s4 = scalar_lea.sflag [#allocation3], %s136_s22 }
   0xd   : > { %s2330_s28 = scalar_lea.hbm %s2673_s1, %s2143_s24  ;;  %s147_s30 = sshll.u32 %s140_s29, 4  ;;  %s2332_s30 = int_to_ptr.vmem [resolvable:$true] %s147_s30 }
   0xe   : > { %s2190_s5 = scalar_lea.hbm %s2330_s28, 10240  ;;  %p2192_p10 = pneg %p2323_p8 }
   0xf   : > { %p2191_p9 = scmp.ne.s32.totalorder %s2330_s28, %s2190_s5  ;;  %s2195_s8 = scalar_lea.hbm %s2673_s1, 20480 }
  0x10   : > { %p2196_p13 = scmp.lt.u32.totalorder %s2330_s28, %s2673_s1  ;;  %p2197_p0 = scmp.lt.u32.totalorder %s2195_s8, %s2190_s5 }
  0x11   : > { %p2193_p11 = pnand %p2192_p10, %p2191_p9  ;;  %p2199_p2 = scmp.lt.u32.totalorder %s2190_s5, %s2330_s28 }
  0x12   : > { %p2198_p1 = por %p2197_p0, %p2196_p13 }
  0x13   : > { %p2194_p12 = pneg %p2193_p11 }
  0x14   : > { %p2200_p3 = por %p2199_p2, %p2198_p1 }
  0x16   : > { %p2201_p4 = pnand %p2200_p3, %p2194_p12 }
  0x18   : > { %2204 = shalt.err (!%p2201_p4)
}
  0x19   : > { %s2205_s11 = scalar_lea.vmem %s2332_s30, 10240  ;;  %s2256_s12 = smov [#allocation2]  }
  0x1a   : > { %p2206_p5 = scmp.ne.s32.totalorder %s2332_s30, %s2205_s11  ;;  %s2210_s18 = sshll.u32 %s2256_s12, 4  ;;  %s2211_s18 = int_to_ptr.vmem [resolvable:$false] %s2210_s18 }
  0x1b   : > { %s2212_s19 = scalar_lea.vmem %s2211_s18, 20480  ;;  %p2213_p11 = scmp.lt.s32.totalorder %s2332_s30, %s2211_s18 }
  0x1c   : > { %p2208_p6 = pnand %p2206_p5, %p2192_p10  ;;  %p2214_p13 = scmp.lt.s32.totalorder %s2212_s19, %s2205_s11 }
  0x1e   : > { %p2209_p9 = pneg %p2208_p6  ;;  %p2215_p0 = por %p2214_p13, %p2213_p11 }
  0x20   : > { %p2216_p1 = pnand %p2215_p0, %p2209_p9 }
  0x22   : > { %2219 = shalt.err (!%p2216_p1)
}
  0x23   : > { %s2257_s22 = smov 5120   ;;  %s2258_s23 = smov 2560  }
  0x24   : > { %s2259_s24 = smov 160   ;;  %p2039_p10 = scmp.ge.s32.totalorder %s2254_s15, 1 }
  0x25   : > { %2151 = dma.hbm_to_vmem [thread:$0]  (!%p2323_p8), %s2330_s28, 10240, %s2332_s30, %s2334_s4, %s2257_s22, %s2258_s23, %s2259_s24  }
  0x26   : > { %p163_p12 = scmp.lt.s32.totalorder %s2254_s15, 3 }
  0x28   : > { %p164_p2 = pnand %p2039_p10, %p163_p12 }
  0x29   : > { %s169_s26 = sand.u32 (!%p164_p2), 1, %s2246_s13  }
  0x2a   : > { %167 = sbr.rel (%p164_p2) target bundleno = 356 (0x164), region = 32  ;;  %s170_s29 = scalar_lea.sflag (!%p164_p2), [#allocation3], %s169_s26 }
  0x2b   : > { %s2145_s27 = smul.u32 (!%p164_p2), 640, %s169_s26 }
  0x2d   : > { %s2365_s5 = scalar_lea.vmem (!%p164_p2), [#allocation2], %s2145_s27 }
  0x31   : > { %2237 = dma.done.wait (%p2317_p7), %s170_s29, 10240  }
  0x32   : > { %2239 = vsyncadd (%p2317_p7), %s170_s29, 4294957056  ;;  %v2260_v0 = vmov 0   ;;  %v214_v1 = vld [vmem:[%s2365_s5] sm:$0xff]  ;;  %v215_v3 = vld [vmem:[%s2365_s5 + $0x8] sm:$0xff]  ;;  %vm904_vm0 = vcmask 261120   ;;  %s201_s28 = smul.u32 40, %s2034_s16 }
  0x33   : > { %940 = vmatprep.mubr.bf16.mxu0 %v2260_v0  ;;  %981 = vmatprep.mubr.bf16.mxu1 %v2260_v0  ;;  %v234_v2 = vld [vmem:[%s2365_s5 + $0xa0] sm:$0xff]  ;;  %v235_v5 = vld [vmem:[%s2365_s5 + $0xa8] sm:$0xff]  ;;  %v216_v15 = vld [vmem:[%s2365_s5 + $0x10] sm:$0xff] }
  0x34   : > { %v2042_v4 = vcombine.high %v214_v1, %v234_v2  ;;  %v2041_v6 = vcombine.low %v214_v1, %v234_v2  ;;  %v254_v7 = vld [vmem:[%s2365_s5 + $0x140] sm:$0xff]  ;;  %v2044_v9 = vcombine.high %v215_v3, %v235_v5  ;;  %v2043_v10 = vcombine.low %v215_v3, %v235_v5  ;;  %v255_v12 = vld [vmem:[%s2365_s5 + $0x148] sm:$0xff]  ;;  %v236_v16 = vld [vmem:[%s2365_s5 + $0xb0] sm:$0xff]  ;;  %p202_p7 = scmp.lt.s32.totalorder %s201_s28, 79 }
  0x35   : > { %v274_v8 = vld [vmem:[%s2365_s5 + $0x1e0] sm:$0xff]  ;;  %v275_v13 = vld [vmem:[%s2365_s5 + $0x1e8] sm:$0xff]  ;;  %v217_v17 = vld [vmem:[%s2365_s5 + $0x18] sm:$0xff]  ;;  %v2046_v21 = vcombine.high %v216_v15, %v236_v16  ;;  %v2045_v28 = vcombine.low %v216_v15, %v236_v16 }
  0x36   : > { %v2082_v11 = vcombine.high %v254_v7, %v274_v8  ;;  %908 = vmatprep.subr.bf16.mxu0 %v2042_v4  ;;  %v2084_v14 = vcombine.high %v255_v12, %v275_v13  ;;  %949 = vmatprep.subr.bf16.mxu1 %v2044_v9  ;;  %v2081_v18 = vcombine.low %v254_v7, %v274_v8  ;;  %v237_v19 = vld [vmem:[%s2365_s5 + $0xb8] sm:$0xff]  ;;  %v256_v23 = vld [vmem:[%s2365_s5 + $0x150] sm:$0xff]  ;;  %v2392_v27 = vld [vmem:[%s2672_s0] sm:$0x1]  ;;  %s2683_s28 = smov (!%p202_p7, %s201_s28), 79 }
  0x37   : > { %909 = vmatpush1.bf16.msra.mxu0 %v2041_v6  ;;  %950 = vmatpush1.bf16.msra.mxu1 %v2043_v10  ;;  %v2083_v20 = vcombine.low %v255_v12, %v275_v13  ;;  %v2048_v22 = vcombine.high %v217_v17, %v237_v19  ;;  %v276_v24 = vld [vmem:[%s2365_s5 + $0x1f0] sm:$0xff]  ;;  %v257_v25 = vld [vmem:[%s2365_s5 + $0x158] sm:$0xff]  ;;  %v2047_v29 = vcombine.low %v217_v17, %v237_v19  ;;  %v218_v32 = vld [vmem:[%s2365_s5 + $0x20] sm:$0xff]  ;;  %s2524_s6 = scalar_lea.vmem %s2674_s2, %s2683_s28  ;;  %s2040_s15 = sshll.u32 %s2683_s28, 1 }
  0x38   : > { %910 = vmatprep.subr.bf16.mxu0 %v2082_v11  ;;  %951 = vmatprep.subr.bf16.mxu1 %v2084_v14  ;;  %v277_v26 = vld [vmem:[%s2365_s5 + $0x1f8] sm:$0xff]  ;;  %v2086_v30 = vcombine.high %v256_v23, %v276_v24  ;;  %v238_v33 = vld [vmem:[%s2365_s5 + $0xc0] sm:$0xff]  ;;  %v219_v34 = vld [vmem:[%s2365_s5 + $0x28] sm:$0xff]  ;;  %v2085_v36 = vcombine.low %v256_v23, %v276_v24  ;;  %s2578_s8 = scalar_lea.vmem %s2675_s3, %s2040_s15 }
  0x39   : > { %v2088_v31 = vcombine.high %v257_v25, %v277_v26  ;;  %v239_v35 = vld [vmem:[%s2365_s5 + $0xc8] sm:$0xff]  ;;  %v2087_v37 = vcombine.low %v257_v25, %v277_v26  ;;  %v2050_v38 = vcombine.high %v218_v32, %v238_v33  ;;  %v258_v40 = vld [vmem:[%s2365_s5 + $0x160] sm:$0xff]  ;;  %v2049_v44 = vcombine.low %v218_v32, %v238_v33  ;;  %v220_v48 = vld [vmem:[%s2365_s5 + $0x30] sm:$0xff] }
  0x3a   : > { %v2052_v39 = vcombine.high %v219_v34, %v239_v35  ;;  %v278_v41 = vld [vmem:[%s2365_s5 + $0x200] sm:$0xff]  ;;  %v259_v42 = vld [vmem:[%s2365_s5 + $0x168] sm:$0xff]  ;;  %v2051_v45 = vcombine.low %v219_v34, %v239_v35  ;;  %v240_v49 = vld [vmem:[%s2365_s5 + $0xd0] sm:$0xff] }
  0x3b   : > { %911 = vmatpush1.bf16.msra.mxu0 %v2081_v18  ;;  %952 = vmatpush1.bf16.msra.mxu1 %v2083_v20  ;;  %v279_v43 = vld [vmem:[%s2365_s5 + $0x208] sm:$0xff]  ;;  %v2090_v46 = vcombine.high %v258_v40, %v278_v41  ;;  %v221_v50 = vld [vmem:[%s2365_s5 + $0x38] sm:$0xff]  ;;  %v2089_v52 = vcombine.low %v258_v40, %v278_v41  ;;  %v2054_v54 = vcombine.high %v220_v48, %v240_v49  ;;  %v260_v56 = vld [vmem:[%s2365_s5 + $0x170] sm:$0xff] }
  0x3c   : > { %990 = vmatprep.subr.bf16.mxu0 %v2046_v21  ;;  %1031 = vmatprep.subr.bf16.mxu1 %v2048_v22  ;;  %v2092_v47 = vcombine.high %v259_v42, %v279_v43  ;;  %v241_v51 = vld [vmem:[%s2365_s5 + $0xd8] sm:$0xff]  ;;  %v2091_v53 = vcombine.low %v259_v42, %v279_v43  ;;  %v280_v57 = vld [vmem:[%s2365_s5 + $0x210] sm:$0xff]  ;;  %v2053_v60 = vcombine.low %v220_v48, %v240_v49  ;;  %v222_v1 = vld [vmem:[%s2365_s5 + $0x40] sm:$0xff] }
  0x3d   : > { %v2056_v55 = vcombine.high %v221_v50, %v241_v51  ;;  %v261_v58 = vld [vmem:[%s2365_s5 + $0x178] sm:$0xff]  ;;  %v2055_v61 = vcombine.low %v221_v50, %v241_v51  ;;  %v2094_v62 = vcombine.high %v260_v56, %v280_v57  ;;  %v242_v2 = vld [vmem:[%s2365_s5 + $0xe0] sm:$0xff]  ;;  %v223_v3 = vld [vmem:[%s2365_s5 + $0x48] sm:$0xff]  ;;  %v2093_v5 = vcombine.low %v260_v56, %v280_v57 }
  0x3e   : > { %2121 = vmatmul.mubr.msk.bf16.vlgmr.msra.gmra.mrb[0].mxu0 %vm904_vm0, %v2392_v27  ;;  %2122 = vmatmul.mubr.msk.bf16.vlgmr.msra.gmra.mrb[0].mxu1 %vm904_vm0, %v2392_v27  ;;  %v281_v59 = vld [vmem:[%s2365_s5 + $0x218] sm:$0xff]  ;;  %v243_v4 = vld [vmem:[%s2365_s5 + $0xe8] sm:$0xff]  ;;  %v2058_v7 = vcombine.high %v222_v1, %v242_v2  ;;  %v262_v9 = vld [vmem:[%s2365_s5 + $0x180] sm:$0xff]  ;;  %v2057_v13 = vcombine.low %v222_v1, %v242_v2 }
  0x3f   : > { %991 = vmatpush1.bf16.msra.mxu0 %v2045_v28  ;;  %1032 = vmatpush1.bf16.msra.mxu1 %v2047_v29  ;;  %v2096_v63 = vcombine.high %v261_v58, %v281_v59  ;;  %v2095_v6 = vcombine.low %v261_v58, %v281_v59  ;;  %v2060_v8 = vcombine.high %v223_v3, %v243_v4  ;;  %v282_v10 = vld [vmem:[%s2365_s5 + $0x220] sm:$0xff]  ;;  %v263_v11 = vld [vmem:[%s2365_s5 + $0x188] sm:$0xff]  ;;  %v224_v17 = vld [vmem:[%s2365_s5 + $0x50] sm:$0xff] }
  0x40   : > { %992 = vmatprep.subr.bf16.mxu0 %v2086_v30  ;;  %1033 = vmatprep.subr.bf16.mxu1 %v2088_v31  ;;  %v283_v12 = vld [vmem:[%s2365_s5 + $0x228] sm:$0xff]  ;;  %v2059_v14 = vcombine.low %v223_v3, %v243_v4  ;;  %v2098_v15 = vcombine.high %v262_v9, %v282_v10  ;;  %v244_v18 = vld [vmem:[%s2365_s5 + $0xf0] sm:$0xff]  ;;  %v225_v19 = vld [vmem:[%s2365_s5 + $0x58] sm:$0xff]  ;;  %v2097_v21 = vcombine.low %v262_v9, %v282_v10 }
  0x41   : > { %1022 = vmatprep.mubr.bf16.mxu0 %v2260_v0  ;;  %1063 = vmatprep.mubr.bf16.mxu1 %v2260_v0  ;;  %v2100_v16 = vcombine.high %v263_v11, %v283_v12  ;;  %v245_v20 = vld [vmem:[%s2365_s5 + $0xf8] sm:$0xff]  ;;  %v2099_v22 = vcombine.low %v263_v11, %v283_v12  ;;  %v2062_v23 = vcombine.high %v224_v17, %v244_v18  ;;  %v264_v25 = vld [vmem:[%s2365_s5 + $0x190] sm:$0xff]  ;;  %v226_v34 = vld [vmem:[%s2365_s5 + $0x60] sm:$0xff] }
  0x42   : > { %v2064_v24 = vcombine.high %v225_v19, %v245_v20  ;;  %v284_v26 = vld [vmem:[%s2365_s5 + $0x230] sm:$0xff]  ;;  %v265_v28 = vld [vmem:[%s2365_s5 + $0x198] sm:$0xff]  ;;  %v2061_v30 = vcombine.low %v224_v17, %v244_v18  ;;  %v2063_v31 = vcombine.low %v225_v19, %v245_v20  ;;  %v246_v35 = vld [vmem:[%s2365_s5 + $0x100] sm:$0xff] }
  0x43   : > { %993 = vmatpush1.bf16.msra.mxu0 %v2085_v36  ;;  %1034 = vmatpush1.bf16.msra.mxu1 %v2087_v37  ;;  %v285_v29 = vld [vmem:[%s2365_s5 + $0x238] sm:$0xff]  ;;  %v2102_v32 = vcombine.high %v264_v25, %v284_v26  ;;  %v227_v36 = vld [vmem:[%s2365_s5 + $0x68] sm:$0xff]  ;;  %v2066_v40 = vcombine.high %v226_v34, %v246_v35  ;;  %v266_v42 = vld [vmem:[%s2365_s5 + $0x1a0] sm:$0xff] }
  0x44   : > { %1072 = vmatprep.subr.bf16.mxu0 %v2050_v38  ;;  %1113 = vmatprep.subr.bf16.mxu1 %v2052_v39  ;;  %v2104_v33 = vcombine.high %v265_v28, %v285_v29  ;;  %v247_v37 = vld [vmem:[%s2365_s5 + $0x108] sm:$0xff]  ;;  %v2101_v38 = vcombine.low %v264_v25, %v284_v26  ;;  %v2103_v39 = vcombine.low %v265_v28, %v285_v29  ;;  %v286_v43 = vld [vmem:[%s2365_s5 + $0x240] sm:$0xff]  ;;  %v228_v50 = vld [vmem:[%s2365_s5 + $0x70] sm:$0xff] }
  0x45   : > { %v2068_v41 = vcombine.high %v227_v36, %v247_v37  ;;  %v2106_v48 = vcombine.high %v266_v42, %v286_v43  ;;  %v248_v51 = vld [vmem:[%s2365_s5 + $0x110] sm:$0xff]  ;;  %v230_v3 = vld [vmem:[%s2365_s5 + $0x80] sm:$0xff] }
  0x46   : > { %2123 = vmatmul.mubr.msk.bf16.vlgmr.msra.gmra.mrb[4].mxu0 %vm904_vm0, %v2392_v27  ;;  %2124 = vmatmul.mubr.msk.bf16.vlgmr.msra.gmra.mrb[4].mxu1 %vm904_vm0, %v2392_v27  ;;  %v2070_v56 = vcombine.high %v228_v50, %v248_v51  ;;  %v268_v58 = vld [vmem:[%s2365_s5 + $0x1b0] sm:$0xff]  ;;  %v250_v4 = vld [vmem:[%s2365_s5 + $0x120] sm:$0xff] }
  0x47   : > { %1073 = vmatpush1.bf16.msra.mxu0 %v2049_v44  ;;  %1114 = vmatpush1.bf16.msra.mxu1 %v2051_v45  ;;  %v267_v44 = vld [vmem:[%s2365_s5 + $0x1a8] sm:$0xff]  ;;  %v288_v59 = vld [vmem:[%s2365_s5 + $0x250] sm:$0xff]  ;;  %v2074_v9 = vcombine.high %v230_v3, %v250_v4  ;;  %v270_v11 = vld [vmem:[%s2365_s5 + $0x1c0] sm:$0xff] }
  0x48   : > { %1074 = vmatprep.subr.bf16.mxu0 %v2090_v46  ;;  %1115 = vmatprep.subr.bf16.mxu1 %v2092_v47  ;;  %v287_v45 = vld [vmem:[%s2365_s5 + $0x248] sm:$0xff]  ;;  %v2065_v46 = vcombine.low %v226_v34, %v246_v35  ;;  %v2067_v47 = vcombine.low %v227_v36, %v247_v37  ;;  %v2110_v1 = vcombine.high %v268_v58, %v288_v59  ;;  %v290_v12 = vld [vmem:[%s2365_s5 + $0x260] sm:$0xff]  ;;  %v232_v19 = vld [vmem:[%s2365_s5 + $0x90] sm:$0xff] }
  0x49   : > { %1104 = vmatprep.mubr.bf16.mxu0 %v2260_v0  ;;  %1145 = vmatprep.mubr.bf16.mxu1 %v2260_v0  ;;  %v2108_v49 = vcombine.high %v267_v44, %v287_v45  ;;  %v2114_v17 = vcombine.high %v270_v11, %v290_v12  ;;  %v252_v20 = vld [vmem:[%s2365_s5 + $0x130] sm:$0xff] }
  0x4a   : > { %v2078_v25 = vcombine.high %v232_v19, %v252_v20  ;;  %v272_v28 = vld [vmem:[%s2365_s5 + $0x1d0] sm:$0xff] }
  0x4b   : > { %1075 = vmatpush1.bf16.msra.mxu0 %v2089_v52  ;;  %1116 = vmatpush1.bf16.msra.mxu1 %v2091_v53  ;;  %v229_v52 = vld [vmem:[%s2365_s5 + $0x78] sm:$0xff]  ;;  %v292_v29 = vld [vmem:[%s2365_s5 + $0x270] sm:$0xff] }
  0x4c   : > { %1154 = vmatprep.subr.bf16.mxu0 %v2054_v54  ;;  %1195 = vmatprep.subr.bf16.mxu1 %v2056_v55  ;;  %v249_v53 = vld [vmem:[%s2365_s5 + $0x118] sm:$0xff]  ;;  %v2105_v54 = vcombine.low %v266_v42, %v286_v43  ;;  %v2107_v55 = vcombine.low %v267_v44, %v287_v45  ;;  %v2118_v34 = vcombine.high %v272_v28, %v292_v29  ;;  %v2535_v42 = vld [vmem:[%s2524_s6 + $0x20] sm:$0xff] }
  0x4d   : > { %v2072_v57 = vcombine.high %v229_v52, %v249_v53  ;;  %v2117_v36 = vcombine.low %v272_v28, %v292_v29 }
  0x4e   : > { %2125 = vmatmul.mubr.msk.bf16.vlgmr.msra.gmra.mrb[8].mxu0 %vm904_vm0, %v2392_v27  ;;  %2126 = vmatmul.mubr.msk.bf16.vlgmr.msra.gmra.mrb[8].mxu1 %vm904_vm0, %v2392_v27 }
  0x4f   : > { %1155 = vmatpush1.bf16.msra.mxu0 %v2053_v60  ;;  %1196 = vmatpush1.bf16.msra.mxu1 %v2055_v61  ;;  %v269_v60 = vld [vmem:[%s2365_s5 + $0x1b8] sm:$0xff] }
  0x50   : > { %1156 = vmatprep.subr.bf16.mxu0 %v2094_v62  ;;  %1197 = vmatprep.subr.bf16.mxu1 %v2096_v63  ;;  %v289_v61 = vld [vmem:[%s2365_s5 + $0x258] sm:$0xff]  ;;  %v2069_v62 = vcombine.low %v228_v50, %v248_v51  ;;  %v2071_v63 = vcombine.low %v229_v52, %v249_v53 }
  0x51   : > { %1186 = vmatprep.mubr.bf16.mxu0 %v2260_v0  ;;  %1227 = vmatprep.mubr.bf16.mxu1 %v2260_v0  ;;  %v2112_v2 = vcombine.high %v269_v60, %v289_v61 }
  0x53   : > { %1157 = vmatpush1.bf16.msra.mxu0 %v2093_v5  ;;  %1198 = vmatpush1.bf16.msra.mxu1 %v2095_v6  ;;  %v231_v5 = vld [vmem:[%s2365_s5 + $0x88] sm:$0xff] }
  0x54   : > { %1236 = vmatprep.subr.bf16.mxu0 %v2058_v7  ;;  %1277 = vmatprep.subr.bf16.mxu1 %v2060_v8  ;;  %v251_v6 = vld [vmem:[%s2365_s5 + $0x128] sm:$0xff]  ;;  %v2109_v7 = vcombine.low %v268_v58, %v288_v59  ;;  %v2111_v8 = vcombine.low %v269_v60, %v289_v61 }
  0x55   : > { %v2076_v10 = vcombine.high %v231_v5, %v251_v6 }
  0x56   : > { %2127 = vmatmul.mubr.msk.bf16.vlgmr.msra.gmra.mrb[12].mxu0 %vm904_vm0, %v2392_v27  ;;  %2128 = vmatmul.mubr.msk.bf16.vlgmr.msra.gmra.mrb[12].mxu1 %vm904_vm0, %v2392_v27 }
  0x57   : > { %1237 = vmatpush1.bf16.msra.mxu0 %v2057_v13  ;;  %1278 = vmatpush1.bf16.msra.mxu1 %v2059_v14  ;;  %v271_v13 = vld [vmem:[%s2365_s5 + $0x1c8] sm:$0xff] }
  0x58   : > { %1238 = vmatprep.subr.bf16.mxu0 %v2098_v15  ;;  %1279 = vmatprep.subr.bf16.mxu1 %v2100_v16  ;;  %v291_v14 = vld [vmem:[%s2365_s5 + $0x268] sm:$0xff]  ;;  %v2073_v15 = vcombine.low %v230_v3, %v250_v4  ;;  %v2075_v16 = vcombine.low %v231_v5, %v251_v6 }
  0x59   : > { %1268 = vmatprep.mubr.bf16.mxu0 %v2260_v0  ;;  %1309 = vmatprep.mubr.bf16.mxu1 %v2260_v0  ;;  %v2116_v18 = vcombine.high %v271_v13, %v291_v14 }
  0x5b   : > { %1239 = vmatpush1.bf16.msra.mxu0 %v2097_v21  ;;  %1280 = vmatpush1.bf16.msra.mxu1 %v2099_v22  ;;  %v233_v21 = vld [vmem:[%s2365_s5 + $0x98] sm:$0xff] }
  0x5c   : > { %1318 = vmatprep.subr.bf16.mxu0 %v2062_v23  ;;  %1359 = vmatprep.subr.bf16.mxu1 %v2064_v24  ;;  %v253_v22 = vld [vmem:[%s2365_s5 + $0x138] sm:$0xff]  ;;  %v2113_v23 = vcombine.low %v270_v11, %v290_v12  ;;  %v2115_v24 = vcombine.low %v271_v13, %v291_v14 }
  0x5d   : > { %v2080_v26 = vcombine.high %v233_v21, %v253_v22 }
  0x5e   : > { %2129 = vmatmul.mubr.msk.bf16.vlgmr.msra.gmra.mrb[16].mxu0 %vm904_vm0, %v2392_v27  ;;  %2130 = vmatmul.mubr.msk.bf16.vlgmr.msra.gmra.mrb[16].mxu1 %vm904_vm0, %v2392_v27 }
  0x5f   : > { %1319 = vmatpush1.bf16.msra.mxu0 %v2061_v30  ;;  %1360 = vmatpush1.bf16.msra.mxu1 %v2063_v31  ;;  %v273_v30 = vld [vmem:[%s2365_s5 + $0x1d8] sm:$0xff] }
  0x60   : > { %1320 = vmatprep.subr.bf16.mxu0 %v2102_v32  ;;  %1361 = vmatprep.subr.bf16.mxu1 %v2104_v33  ;;  %v293_v31 = vld [vmem:[%s2365_s5 + $0x278] sm:$0xff]  ;;  %v2077_v32 = vcombine.low %v232_v19, %v252_v20  ;;  %v2079_v33 = vcombine.low %v233_v21, %v253_v22 }
  0x61   : > { %1350 = vmatprep.mubr.bf16.mxu0 %v2260_v0  ;;  %1391 = vmatprep.mubr.bf16.mxu1 %v2260_v0  ;;  %v2120_v35 = vcombine.high %v273_v30, %v293_v31  ;;  %v2119_v37 = vcombine.low %v273_v30, %v293_v31  ;;  %v295_v31 = vld [vmem:[%s2524_s6 + $0x8] sm:$0xff] }
  0x63   : > { %1321 = vmatpush1.bf16.msra.mxu0 %v2101_v38  ;;  %1362 = vmatpush1.bf16.msra.mxu1 %v2103_v39  ;;  %v304_v38 = vlaneseq }
  0x64   : > { %1400 = vmatprep.subr.bf16.mxu0 %v2066_v40  ;;  %1441 = vmatprep.subr.bf16.mxu1 %v2068_v41 }
  0x65   : > { %v305_v39 = vshrl.u32 %v304_v38, 7 }
  0x66   : > { %2131 = vmatmul.mubr.msk.bf16.vlgmr.msra.gmra.mrb[20].mxu0 %vm904_vm0, %v2392_v27  ;;  %2132 = vmatmul.mubr.msk.bf16.vlgmr.msra.gmra.mrb[20].mxu1 %vm904_vm0, %v2392_v27 }
  0x67   : > { %1401 = vmatpush1.bf16.msra.mxu0 %v2065_v46  ;;  %1442 = vmatpush1.bf16.msra.mxu1 %v2067_v47  ;;  %v2528_v40 = vsub.s32 2, %v305_v39  ;;  %v2532_v41 = vsub.s32 3, %v305_v39  ;;  %v2545_v47 = vsub.s32 4, %v305_v39  ;;  %v2551_v50 = vsub.s32 7, %v305_v39 }
  0x68   : > { %1402 = vmatprep.subr.bf16.mxu0 %v2106_v48  ;;  %1443 = vmatprep.subr.bf16.mxu1 %v2108_v49  ;;  %v2547_v48 = vsub.s32 6, %v305_v39  ;;  %v2549_v49 = vsub.s32 5, %v305_v39 }
  0x69   : > { %1432 = vmatprep.mubr.bf16.mxu0 %v2260_v0  ;;  %1473 = vmatprep.mubr.bf16.mxu1 %v2260_v0  ;;  %v443_v44 = vrot.slane %v2535_v42, %v2528_v40  ;;  %v447_v46 = vrot.slane %v2535_v42, %v2532_v41  ;;  %v451_v51 = vrot.slane %v2535_v42, %v2545_v47 }
  0x6a   : > { %v459_v52 = vrot.slane %v2535_v42, %v2547_v48  ;;  %v455_v53 = vrot.slane %v2535_v42, %v2549_v49 }
  0x6b   : > { %1403 = vmatpush1.bf16.msra.mxu0 %v2105_v54  ;;  %1444 = vmatpush1.bf16.msra.mxu1 %v2107_v55  ;;  %v463_v54 = vrot.slane %v2535_v42, %v2551_v50  ;;  %v294_v55 = vld [vmem:[%s2524_s6] sm:$0xff] }
  0x6c   : > { %1482 = vmatprep.subr.bf16.mxu0 %v2070_v56  ;;  %1523 = vmatprep.subr.bf16.mxu1 %v2072_v57  ;;  %v2261_v56 = vmov 1983009808   ;;  %v315_v59 = vrot.slane %v294_v55, %v2528_v40  ;;  %v335_v20 = vrot.slane %v294_v55, %v2551_v50 }
  0x6d   : > { %v1771_v57 = vunpack.c.l.s4 %v2261_v56 }
  0x6e   : > { %2133 = vmatmul.mubr.msk.bf16.vlgmr.msra.gmra.mrb[24].mxu0 %vm904_vm0, %v2392_v27  ;;  %2134 = vmatmul.mubr.msk.bf16.vlgmr.msra.gmra.mrb[24].mxu1 %vm904_vm0, %v2392_v27 }
  0x6f   : > { %1483 = vmatpush1.bf16.msra.mxu0 %v2069_v62  ;;  %1524 = vmatpush1.bf16.msra.mxu1 %v2071_v63  ;;  %v1772_v61 = vunpack.c.0.s8 %v1771_v57  ;;  %v319_v62 = vrot.slane %v294_v55, %v2532_v41 }
  0x70   : > { %1484 = vmatprep.subr.bf16.mxu0 %v2110_v1  ;;  %1525 = vmatprep.subr.bf16.mxu1 %v2112_v2 }
  0x71   : > { %1514 = vmatprep.mubr.bf16.mxu0 %v2260_v0  ;;  %1555 = vmatprep.mubr.bf16.mxu1 %v2260_v0  ;;  %v2566_v6 = vsub.s32 %v1772_v61, %v305_v39 }
  0x73   : > { %1485 = vmatpush1.bf16.msra.mxu0 %v2109_v7  ;;  %1526 = vmatpush1.bf16.msra.mxu1 %v2111_v8 }
  0x74   : > { %1564 = vmatprep.subr.bf16.mxu0 %v2074_v9  ;;  %1605 = vmatprep.subr.bf16.mxu1 %v2076_v10 }
  0x76   : > { %2135 = vmatmul.mubr.msk.bf16.vlgmr.msra.gmra.mrb[28].mxu0 %vm904_vm0, %v2392_v27  ;;  %2136 = vmatmul.mubr.msk.bf16.vlgmr.msra.gmra.mrb[28].mxu1 %vm904_vm0, %v2392_v27 }
  0x77   : > { %1565 = vmatpush1.bf16.msra.mxu0 %v2073_v15  ;;  %1606 = vmatpush1.bf16.msra.mxu1 %v2075_v16  ;;  %v323_v15 = vrot.slane %v294_v55, %v2545_v47 }
  0x78   : > { %1566 = vmatprep.subr.bf16.mxu0 %v2114_v17  ;;  %1607 = vmatprep.subr.bf16.mxu1 %v2116_v18  ;;  %v331_v17 = vrot.slane %v294_v55, %v2547_v48  ;;  %v327_v18 = vrot.slane %v294_v55, %v2549_v49 }
  0x79   : > { %1596 = vmatprep.mubr.bf16.mxu0 %v2260_v0  ;;  %1637 = vmatprep.mubr.bf16.mxu1 %v2260_v0 }
  0x7b   : > { %1567 = vmatpush1.bf16.msra.mxu0 %v2113_v23  ;;  %1608 = vmatpush1.bf16.msra.mxu1 %v2115_v24 }
  0x7c   : > { %1646 = vmatprep.subr.bf16.mxu0 %v2078_v25  ;;  %1687 = vmatprep.subr.bf16.mxu1 %v2080_v26 }
  0x7e   : > { %2137 = vmatmul.mubr.msk.bf16.vlgmr.msra.gmra.mrb[32].mxu0 %vm904_vm0, %v2392_v27  ;;  %2138 = vmatmul.mubr.msk.bf16.vlgmr.msra.gmra.mrb[32].mxu1 %vm904_vm0, %v2392_v27 }
  0x7f   : > { %1647 = vmatpush1.bf16.msra.mxu0 %v2077_v32  ;;  %1688 = vmatpush1.bf16.msra.mxu1 %v2079_v33 }
  0x80   : > { %1648 = vmatprep.subr.bf16.mxu0 %v2118_v34  ;;  %1689 = vmatprep.subr.bf16.mxu1 %v2120_v35 }
  0x81   : > { %1678 = vmatprep.mubr.bf16.mxu0 %v2260_v0  ;;  %1719 = vmatprep.mubr.bf16.mxu1 %v2260_v0  ;;  %v2526_v0 = vsub.s32 0, %v305_v39 }
  0x83   : > { %1649 = vmatpush1.bf16.msra.mxu0 %v2117_v36  ;;  %1690 = vmatpush1.bf16.msra.mxu1 %v2119_v37  ;;  %v435_v43 = vrot.slane %v2535_v42, %v2526_v0  ;;  %v307_v58 = vrot.slane %v294_v55, %v2526_v0  ;;  %v339_v38 = vrot.slane %v295_v31, %v2526_v0 }
  0x86   : > { %2139 = vmatmul.mubr.msk.bf16.vlgmr.msra.gmra.mrb[36].mxu0 %vm904_vm0, %v2392_v27  ;;  %2140 = vmatmul.mubr.msk.bf16.vlgmr.msra.gmra.mrb[36].mxu1 %vm904_vm0, %v2392_v27  ;;  %v2530_v27 = vsub.s32 1, %v305_v39 }
  0x88   : > { %v439_v45 = vrot.slane %v2535_v42, %v2530_v27  ;;  %v311_v60 = vrot.slane %v294_v55, %v2530_v27  ;;  %v347_v55 = vrot.slane %v295_v31, %v2528_v40  ;;  %v343_v56 = vrot.slane %v295_v31, %v2530_v27 }
 0x111   : > { %v942_v63 = vpop.f32.mrb[0].mxu0  ;;  %v983_v2 = vpop.f32.mrb[0].mxu1 }
 0x112   : > { %v943_v1 = vadd.f32 %v942_v63, %v307_v58  ;;  %v944_v3 = vpop.f32.mrb[1].mxu0  ;;  %v984_v4 = vadd.f32 %v983_v2, %v315_v59  ;;  %v985_v7 = vpop.f32.mrb[1].mxu1  ;;  %v351_v58 = vrot.slane %v295_v31, %v2532_v41 }
 0x113   : > { %v945_v5 = vadd.f32 %v944_v3, %v311_v60  ;;  %v946_v8 = vpop.f32.mrb[2].mxu0  ;;  %v986_v9 = vadd.f32 %v985_v7, %v319_v62  ;;  %v987_v10 = vpop.f32.mrb[2].mxu1 }
 0x114   : > { %v947_v11 = vpop.f32.mrb[3].mxu0  ;;  %v988_v13 = vpop.f32.mrb[3].mxu1 }
 0x115   : > { %v1768_v12 = vcombine.low %v943_v1, %v945_v5  ;;  %v1769_v14 = vcombine.low %v984_v4, %v986_v9 }
 0x117   : > { %v1776_v16 = vrot.slane %v1768_v12, %v2566_v6  ;;  %v1783_v19 = vrot.slane %v1769_v14, %v2566_v6  ;;  %v355_v12 = vrot.slane %v295_v31, %v2545_v47  ;;  %v363_v14 = vrot.slane %v295_v31, %v2547_v48 }
 0x119   : > { %v1024_v21 = vpop.f32.mrb[4].mxu0  ;;  %v1784_v22 = vcombine.low %v1776_v16, %v1783_v19  ;;  %v1065_v24 = vpop.f32.mrb[4].mxu1 }
 0x11a   : > { %v1025_v23 = vadd.f32 %v1024_v21, %v323_v15  ;;  %v1026_v25 = vpop.f32.mrb[5].mxu0  ;;  %v1066_v26 = vadd.f32 %v1065_v24, %v331_v17  ;;  %v1067_v29 = vpop.f32.mrb[5].mxu1  ;;  %v359_v15 = vrot.slane %v295_v31, %v2549_v49  ;;  %v367_v17 = vrot.slane %v295_v31, %v2551_v50 }
 0x11b   : > { %v1027_v28 = vadd.f32 %v1026_v25, %v327_v18  ;;  %v1028_v30 = vpop.f32.mrb[6].mxu0  ;;  %1948 = vst [vmem:[%s2578_s8] sm:$0xff] %v1784_v22  ;;  %v1068_v32 = vadd.f32 %v1067_v29, %v335_v20  ;;  %v1069_v33 = vpop.f32.mrb[6].mxu1 }
 0x11c   : > { %v1029_v34 = vpop.f32.mrb[7].mxu0  ;;  %v1070_v36 = vpop.f32.mrb[7].mxu1 }
 0x11d   : > { %v1785_v35 = vcombine.low %v1025_v23, %v1027_v28  ;;  %v1786_v37 = vcombine.low %v1066_v26, %v1068_v32  ;;  %v296_v28 = vld [vmem:[%s2524_s6 + $0x10] sm:$0xff] }
 0x11e   : > { %v371_v31 = vrot.slane %v296_v28, %v2526_v0 }
 0x11f   : > { %v1793_v39 = vrot.slane %v1785_v35, %v2566_v6  ;;  %v1800_v57 = vrot.slane %v1786_v37, %v2566_v6  ;;  %v379_v37 = vrot.slane %v296_v28, %v2528_v40 }
 0x121   : > { %v1106_v59 = vpop.f32.mrb[8].mxu0  ;;  %v1801_v60 = vcombine.low %v1793_v39, %v1800_v57  ;;  %v1147_v62 = vpop.f32.mrb[8].mxu1 }
 0x122   : > { %v1107_v61 = vadd.f32 %v1106_v59, %v339_v38  ;;  %v1108_v63 = vpop.f32.mrb[9].mxu0  ;;  %v1148_v1 = vadd.f32 %v1147_v62, %v347_v55  ;;  %v1149_v3 = vpop.f32.mrb[9].mxu1  ;;  %v375_v38 = vrot.slane %v296_v28, %v2530_v27  ;;  %v383_v55 = vrot.slane %v296_v28, %v2532_v41 }
 0x123   : > { %v1109_v2 = vadd.f32 %v1108_v63, %v343_v56  ;;  %v1110_v4 = vpop.f32.mrb[10].mxu0  ;;  %1949 = vst [vmem:[%s2578_s8 + $0x8] sm:$0xff] %v1801_v60  ;;  %v1150_v5 = vadd.f32 %v1149_v3, %v351_v58  ;;  %v1151_v7 = vpop.f32.mrb[10].mxu1 }
 0x124   : > { %v1111_v8 = vpop.f32.mrb[11].mxu0  ;;  %v1152_v10 = vpop.f32.mrb[11].mxu1 }
 0x125   : > { %v1802_v9 = vcombine.low %v1107_v61, %v1109_v2  ;;  %v1803_v11 = vcombine.low %v1148_v1, %v1150_v5 }
 0x127   : > { %v1810_v13 = vrot.slane %v1802_v9, %v2566_v6  ;;  %v1817_v16 = vrot.slane %v1803_v11, %v2566_v6  ;;  %v387_v9 = vrot.slane %v296_v28, %v2545_v47  ;;  %v395_v11 = vrot.slane %v296_v28, %v2547_v48 }
 0x129   : > { %v1188_v18 = vpop.f32.mrb[12].mxu0  ;;  %v1818_v19 = vcombine.low %v1810_v13, %v1817_v16  ;;  %v1229_v21 = vpop.f32.mrb[12].mxu1 }
 0x12a   : > { %v1189_v20 = vadd.f32 %v1188_v18, %v355_v12  ;;  %v1190_v22 = vpop.f32.mrb[13].mxu0  ;;  %v1230_v23 = vadd.f32 %v1229_v21, %v363_v14  ;;  %v1231_v25 = vpop.f32.mrb[13].mxu1  ;;  %v391_v12 = vrot.slane %v296_v28, %v2549_v49  ;;  %v399_v14 = vrot.slane %v296_v28, %v2551_v50 }
 0x12b   : > { %v1191_v24 = vadd.f32 %v1190_v22, %v359_v15  ;;  %v1192_v26 = vpop.f32.mrb[14].mxu0  ;;  %1950 = vst [vmem:[%s2578_s8 + $0x10] sm:$0xff] %v1818_v19  ;;  %v1232_v29 = vadd.f32 %v1231_v25, %v367_v17  ;;  %v1233_v30 = vpop.f32.mrb[14].mxu1 }
 0x12c   : > { %v1193_v32 = vpop.f32.mrb[15].mxu0  ;;  %v1234_v34 = vpop.f32.mrb[15].mxu1 }
 0x12d   : > { %v1819_v33 = vcombine.low %v1189_v20, %v1191_v24  ;;  %v1820_v35 = vcombine.low %v1230_v23, %v1232_v29  ;;  %v297_v24 = vld [vmem:[%s2524_s6 + $0x18] sm:$0xff] }
 0x12e   : > { %v403_v28 = vrot.slane %v297_v24, %v2526_v0 }
 0x12f   : > { %v1827_v36 = vrot.slane %v1819_v33, %v2566_v6  ;;  %v1834_v39 = vrot.slane %v1820_v35, %v2566_v6  ;;  %v411_v35 = vrot.slane %v297_v24, %v2528_v40 }
 0x131   : > { %v1270_v56 = vpop.f32.mrb[16].mxu0  ;;  %v1835_v57 = vcombine.low %v1827_v36, %v1834_v39  ;;  %v1311_v59 = vpop.f32.mrb[16].mxu1 }
 0x132   : > { %v1271_v58 = vadd.f32 %v1270_v56, %v371_v31  ;;  %v1272_v60 = vpop.f32.mrb[17].mxu0  ;;  %v1312_v61 = vadd.f32 %v1311_v59, %v379_v37  ;;  %v1313_v63 = vpop.f32.mrb[17].mxu1  ;;  %v407_v31 = vrot.slane %v297_v24, %v2530_v27  ;;  %v415_v37 = vrot.slane %v297_v24, %v2532_v41 }
 0x133   : > { %v1273_v62 = vadd.f32 %v1272_v60, %v375_v38  ;;  %v1274_v1 = vpop.f32.mrb[18].mxu0  ;;  %1951 = vst [vmem:[%s2578_s8 + $0x18] sm:$0xff] %v1835_v57  ;;  %v1314_v2 = vadd.f32 %v1313_v63, %v383_v55  ;;  %v1315_v3 = vpop.f32.mrb[18].mxu1 }
 0x134   : > { %v1275_v4 = vpop.f32.mrb[19].mxu0  ;;  %v1316_v7 = vpop.f32.mrb[19].mxu1 }
 0x135   : > { %v1836_v5 = vcombine.low %v1271_v58, %v1273_v62  ;;  %v1837_v8 = vcombine.low %v1312_v61, %v1314_v2 }
 0x137   : > { %v1844_v10 = vrot.slane %v1836_v5, %v2566_v6  ;;  %v1851_v13 = vrot.slane %v1837_v8, %v2566_v6  ;;  %v419_v5 = vrot.slane %v297_v24, %v2545_v47  ;;  %v427_v8 = vrot.slane %v297_v24, %v2547_v48 }
 0x139   : > { %v1352_v15 = vpop.f32.mrb[20].mxu0  ;;  %v1852_v16 = vcombine.low %v1844_v10, %v1851_v13  ;;  %v1393_v18 = vpop.f32.mrb[20].mxu1 }
 0x13a   : > { %v1353_v17 = vadd.f32 %v1352_v15, %v387_v9  ;;  %v1354_v19 = vpop.f32.mrb[21].mxu0  ;;  %v1394_v20 = vadd.f32 %v1393_v18, %v395_v11  ;;  %v1395_v22 = vpop.f32.mrb[21].mxu1  ;;  %v423_v9 = vrot.slane %v297_v24, %v2549_v49  ;;  %v431_v11 = vrot.slane %v297_v24, %v2551_v50 }
 0x13b   : > { %v1355_v21 = vadd.f32 %v1354_v19, %v391_v12  ;;  %v1356_v23 = vpop.f32.mrb[22].mxu0  ;;  %1952 = vst [vmem:[%s2578_s8 + $0x20] sm:$0xff] %v1852_v16  ;;  %v1396_v25 = vadd.f32 %v1395_v22, %v399_v14  ;;  %v1397_v26 = vpop.f32.mrb[22].mxu1 }
 0x13c   : > { %v1357_v29 = vpop.f32.mrb[23].mxu0  ;;  %v1398_v32 = vpop.f32.mrb[23].mxu1 }
 0x13d   : > { %v1853_v30 = vcombine.low %v1353_v17, %v1355_v21  ;;  %v1854_v33 = vcombine.low %v1394_v20, %v1396_v25 }
 0x13f   : > { %v1861_v34 = vrot.slane %v1853_v30, %v2566_v6  ;;  %v1868_v36 = vrot.slane %v1854_v33, %v2566_v6 }
 0x141   : > { %v1434_v38 = vpop.f32.mrb[24].mxu0  ;;  %v1869_v39 = vcombine.low %v1861_v34, %v1868_v36  ;;  %v1475_v56 = vpop.f32.mrb[24].mxu1 }
 0x142   : > { %v1435_v55 = vadd.f32 %v1434_v38, %v403_v28  ;;  %v1436_v57 = vpop.f32.mrb[25].mxu0  ;;  %v1476_v58 = vadd.f32 %v1475_v56, %v411_v35  ;;  %v1477_v60 = vpop.f32.mrb[25].mxu1 }
 0x143   : > { %v1437_v59 = vadd.f32 %v1436_v57, %v407_v31  ;;  %v1438_v61 = vpop.f32.mrb[26].mxu0  ;;  %1953 = vst [vmem:[%s2578_s8 + $0x28] sm:$0xff] %v1869_v39  ;;  %v1478_v62 = vadd.f32 %v1477_v60, %v415_v37  ;;  %v1479_v63 = vpop.f32.mrb[26].mxu1 }
 0x144   : > { %v1439_v1 = vpop.f32.mrb[27].mxu0  ;;  %v1480_v3 = vpop.f32.mrb[27].mxu1 }
 0x145   : > { %v1870_v2 = vcombine.low %v1435_v55, %v1437_v59  ;;  %v1871_v4 = vcombine.low %v1476_v58, %v1478_v62 }
 0x147   : > { %v1878_v7 = vrot.slane %v1870_v2, %v2566_v6  ;;  %v1885_v10 = vrot.slane %v1871_v4, %v2566_v6 }
 0x149   : > { %v1516_v12 = vpop.f32.mrb[28].mxu0  ;;  %v1886_v13 = vcombine.low %v1878_v7, %v1885_v10  ;;  %v1557_v15 = vpop.f32.mrb[28].mxu1 }
 0x14a   : > { %v1517_v14 = vadd.f32 %v1516_v12, %v419_v5  ;;  %v1518_v16 = vpop.f32.mrb[29].mxu0  ;;  %v1558_v17 = vadd.f32 %v1557_v15, %v427_v8  ;;  %v1559_v19 = vpop.f32.mrb[29].mxu1 }
 0x14b   : > { %v1519_v18 = vadd.f32 %v1518_v16, %v423_v9  ;;  %v1520_v20 = vpop.f32.mrb[30].mxu0  ;;  %1954 = vst [vmem:[%s2578_s8 + $0x30] sm:$0xff] %v1886_v13  ;;  %v1560_v21 = vadd.f32 %v1559_v19, %v431_v11  ;;  %v1561_v22 = vpop.f32.mrb[30].mxu1 }
 0x14c   : > { %v1521_v23 = vpop.f32.mrb[31].mxu0  ;;  %v1562_v26 = vpop.f32.mrb[31].mxu1 }
 0x14d   : > { %v1887_v25 = vcombine.low %v1517_v14, %v1519_v18  ;;  %v1888_v29 = vcombine.low %v1558_v17, %v1560_v21 }
 0x14f   : > { %v1895_v30 = vrot.slane %v1887_v25, %v2566_v6  ;;  %v1902_v24 = vrot.slane %v1888_v29, %v2566_v6 }
 0x151   : > { %v1598_v32 = vpop.f32.mrb[32].mxu0  ;;  %v1903_v33 = vcombine.low %v1895_v30, %v1902_v24  ;;  %v1639_v34 = vpop.f32.mrb[32].mxu1 }
 0x152   : > { %v1599_v28 = vadd.f32 %v1598_v32, %v435_v43  ;;  %v1600_v35 = vpop.f32.mrb[33].mxu0  ;;  %v1640_v31 = vadd.f32 %v1639_v34, %v443_v44  ;;  %v1641_v37 = vpop.f32.mrb[33].mxu1 }
 0x153   : > { %v1601_v36 = vadd.f32 %v1600_v35, %v439_v45  ;;  %v1602_v38 = vpop.f32.mrb[34].mxu0  ;;  %1955 = vst [vmem:[%s2578_s8 + $0x38] sm:$0xff] %v1903_v33  ;;  %v1642_v39 = vadd.f32 %v1641_v37, %v447_v46  ;;  %v1643_v55 = vpop.f32.mrb[34].mxu1 }
 0x154   : > { %v1603_v0 = vpop.f32.mrb[35].mxu0  ;;  %v1644_v56 = vpop.f32.mrb[35].mxu1 }
 0x155   : > { %v1904_v43 = vcombine.low %v1599_v28, %v1601_v36  ;;  %v1905_v57 = vcombine.low %v1640_v31, %v1642_v39 }
 0x157   : > { %v1912_v40 = vrot.slane %v1904_v43, %v2566_v6  ;;  %v1919_v44 = vrot.slane %v1905_v57, %v2566_v6 }
 0x159   : > { %v1680_v58 = vpop.f32.mrb[36].mxu0  ;;  %v1920_v27 = vcombine.low %v1912_v40, %v1919_v44  ;;  %v1721_v59 = vpop.f32.mrb[36].mxu1 }
 0x15a   : > { %v1681_v45 = vadd.f32 %v1680_v58, %v451_v51  ;;  %v1682_v41 = vpop.f32.mrb[37].mxu0  ;;  %v1722_v46 = vadd.f32 %v1721_v59, %v459_v52  ;;  %v1723_v61 = vpop.f32.mrb[37].mxu1 }
 0x15b   : > { %v1683_v60 = vadd.f32 %v1682_v41, %v455_v53  ;;  %v1684_v62 = vpop.f32.mrb[38].mxu0  ;;  %1956 = vst [vmem:[%s2578_s8 + $0x40] sm:$0xff] %v1920_v27  ;;  %v1724_v63 = vadd.f32 %v1723_v61, %v463_v54  ;;  %v1725_v47 = vpop.f32.mrb[38].mxu1 }
 0x15c   : > { %v1685_v51 = vpop.f32.mrb[39].mxu0  ;;  %v1726_v2 = vpop.f32.mrb[39].mxu1 }
 0x15d   : > { %v1921_v1 = vcombine.low %v1681_v45, %v1683_v60  ;;  %v1922_v3 = vcombine.low %v1722_v46, %v1724_v63 }
 0x15f   : > { %v1929_v4 = vrot.slane %v1921_v1, %v2566_v6  ;;  %v1936_v48 = vrot.slane %v1922_v3, %v2566_v6 }
 0x161   : > { %v1937_v52 = vcombine.low %v1929_v4, %v1936_v48 }
 0x163   : > { %1957 = vst [vmem:[%s2578_s8 + $0x48] sm:$0xff] %v1937_v52 }
 0x164 PF: > { %p13_p8 = scmp.ge.s32.totalorder %s2302_s17, 4   ;;  %s2678_s12 = smov %s2246_s13 }
 0x165   : > { %s2679_s13 = smov %s2250_s14  ;;  %s2680_s14 = smov %s2312_s20 }
 0x166   : > { %s2681_s15 = smov %s2302_s17  ;;  %15 = sbr.rel (!%p13_p8) target bundleno = 3 (0x3), region = 75 }
 0x16d   :  { %1980 = vsyncpa [#allocation3], 1 }
 0x16e   :  { %1982 = vsyncpa [#allocation3 + $0x1], 1 }

</bundles_post_ra>
